<compile_context>
chip_gen: v5e
topology: v5e:2x2
jax: 0.10.0
libtpu: 0.0.40
codegen_flags: <defaults>
</compile_context>

<pallas_src>
import functools

import jax
import jax.numpy as jnp
from jax import lax
from jax.experimental import pallas as pl
from jax.experimental.pallas import tpu as pltpu

KSIZE = 5
PAD = KSIZE // 2
LN_EPS = 1e-5


def _round_up(n, m):
    return (n + m - 1) // m * m


def _cdiv(a, b):
    return (a + b - 1) // b


# --------------------------------------------------------------------------------------
# Kernel bodies
# --------------------------------------------------------------------------------------

def _layernorm(h, true_dim, pad_dim, gamma, beta):
    """Two-pass LayerNorm over the last axis of a lane-padded activation.

    Padded lanes of `h` are exactly zero by construction, so after centering they are
    exactly -mu; their spurious contribution to the second moment is removed
    analytically (no iota / mask / select needed).
    """
    inv_n = 1.0 / float(true_dim)
    mu = jnp.sum(h, axis=-1, keepdims=True) * inv_n
    c = h - mu
    ss = jnp.sum(c * c, axis=-1, keepdims=True)
    var = (ss - float(pad_dim - true_dim) * (mu * mu)) * inv_n
    var = jnp.maximum(var, 0.0)
    return c * lax.rsqrt(var + LN_EPS) * gamma + beta


def _tail(x, h1_lin, b1_ref, g1_ref, be1_ref, w2_ref, b2_ref, g2_ref, be2_ref,
          w3_ref, b3_ref, o_ref, *, h1_dim, h1_pad, h2_dim, h2_pad, mm_dtype):
    """Everything after the (possibly K-tiled) first matmul: rest of std_mlp, per-row
    gaussian taps, and the mask-free depthwise 5-tap conv."""
    # ---------------- std_mlp tail ----------------
    h1 = jnp.maximum(h1_lin + b1_ref[...], 0.0)
    h1 = _layernorm(h1, h1_dim, h1_pad, g1_ref[...], be1_ref[...])

    h2 = jnp.dot(h1.astype(mm_dtype), w2_ref[...],
                 preferred_element_type=jnp.float32) + b2_ref[...]
    h2 = jnp.maximum(h2, 0.0)
    h2 = _layernorm(h2, h2_dim, h2_pad, g2_ref[...], be2_ref[...])

    # 64 -> 1 projection: VPU multiply + lane reduction (skip a 1-column MXU matmul).
    logit = jnp.sum(h2 * w3_ref[...], axis=-1, keepdims=True) + b3_ref[...]   # (TB, 1)
    sigma = 0.5 * (jnp.tanh(0.5 * logit) + 1.0) + 1e-10      # stable sigmoid (EUP tanh)

    # ---------- per-row gaussian taps, symmetric taps grouped (center tap == 1) -------
    inv2 = -0.5 / (sigma * sigma)                             # (TB, 1)
    wt1 = jnp.exp(inv2)                                       # |d| == 1
    wt2 = jnp.exp(4.0 * inv2)                                 # |d| == 2
    inv_norm = 1.0 / (1.0 + 2.0 * (wt1 + wt2))

    # ---------------- depthwise (groups=B) conv, zero padding, mask-free --------------
    # C_pad >= C + PAD and x's padded lanes are zero, so every roll wrap-around either
    # reads zero lanes (d < 0) or lands in discarded columns >= C (d > 0): no masking.
    c_pad = x.shape[-1]

    def shifted(d):                                           # s[b, j] = x[b, j + d]
        return pltpu.roll(x, shift=(-d) % c_pad, axis=1)

    acc = x + wt1 * (shifted(-1) + shifted(1)) + wt2 * (shifted(-2) + shifted(2))
    o_ref[...] = (acc * inv_norm).astype(o_ref.dtype)


def _fused_kernel(x_ref, w1_ref, b1_ref, g1_ref, be1_ref, w2_ref, b2_ref, g2_ref,
                  be2_ref, w3_ref, b3_ref, o_ref, *,
                  h1_dim, h1_pad, h2_dim, h2_pad, mm_dtype):
    """Common case: w1 fully resident in VMEM, one fused pass per batch tile."""
    x = x_ref[...]                                            # (TB, C_pad) f32, lane-dense
    h1_lin = jnp.dot(x.astype(mm_dtype), w1_ref[...],
                     preferred_element_type=jnp.float32)
    _tail(x, h1_lin, b1_ref, g1_ref, be1_ref, w2_ref, b2_ref, g2_ref, be2_ref,
          w3_ref, b3_ref, o_ref, h1_dim=h1_dim, h1_pad=h1_pad, h2_dim=h2_dim,
          h2_pad=h2_pad, mm_dtype=mm_dtype)


def _ktiled_kernel(x_ref, xk_ref, w1_ref, b1_ref, g1_ref, be1_ref, w2_ref, b2_ref,
                   g2_ref, be2_ref, w3_ref, b3_ref, o_ref, h1_acc_ref, *,
                   num_k, h1_dim, h1_pad, h2_dim, h2_pad, mm_dtype):
    """Large-in_channels / v7x-VMEM regime: w1 tiled (tk, H1_pad) over the second grid
    axis; h1 accumulated in VMEM scratch; LN / sigma / conv gated on the last K step."""
    k = pl.program_id(1)

    @pl.when(k == 0)
    def _():
        h1_acc_ref[...] = jnp.zeros_like(h1_acc_ref)

    h1_acc_ref[...] += jnp.dot(xk_ref[...].astype(mm_dtype), w1_ref[...],
                               preferred_element_type=jnp.float32)

    @pl.when(k == num_k - 1)
    def _():
        _tail(x_ref[...], h1_acc_ref[...], b1_ref, g1_ref, be1_ref, w2_ref, b2_ref,
              g2_ref, be2_ref, w3_ref, b3_ref, o_ref, h1_dim=h1_dim, h1_pad=h1_pad,
              h2_dim=h2_dim, h2_pad=h2_pad, mm_dtype=mm_dtype)


# --------------------------------------------------------------------------------------
# Host-side planning / weight preparation (hoisted out of the forward path)
# --------------------------------------------------------------------------------------

def _vmem_budget():
    """Chip-aware usable-VMEM estimate with headroom for Mosaic scratch."""
    try:
        cap = int(pltpu.get_tpu_info().vmem_capacity_bytes)   # 128 MiB v5e/v6e, 64 MiB v7x
    except Exception:
        cap = 64 * 1024 * 1024                                # conservative fallback (v7x)
    return cap, max(cap - (16 << 20), 24 << 20)


def prepare_params(params, matmul_dtype=jnp.bfloat16, k_tiles=None):
    """Pad weights lane-dense (multiples of 128), cast matmul weights, plan the tiling.

    Call once and reuse the result: re-padding w1 every forward call would rewrite tens
    of MiB of HBM at large in_channels.
    """
    C, H1 = params["w1"].shape
    H2 = params["w2"].shape[1]

    # >= PAD trailing zero lanes => the 5-tap conv needs no masking at all.
    C_pad = _round_up(C + PAD, 128)
    H1_pad = _round_up(H1, 128)
    H2_pad = _round_up(H2, 128)

    f32 = jnp.float32
    mm = jnp.dtype(matmul_dtype)

    w1 = jnp.zeros((C_pad, H1_pad), mm).at[:C, :H1].set(params["w1"].astype(mm))
    b1 = jnp.zeros((1, H1_pad), f32).at[:, :H1].set(params["b1"].astype(f32))
    g1 = jnp.zeros((1, H1_pad), f32).at[:, :H1].set(params["g1"].astype(f32))
    be1 = jnp.zeros((1, H1_pad), f32).at[:, :H1].set(params["be1"].astype(f32))
    w2 = jnp.zeros((H1_pad, H2_pad), mm).at[:H1, :H2].set(params["w2"].astype(mm))
    b2 = jnp.zeros((1, H2_pad), f32).at[:, :H2].set(params["b2"].astype(f32))
    g2 = jnp.zeros((1, H2_pad), f32).at[:, :H2].set(params["g2"].astype(f32))
    be2 = jnp.zeros((1, H2_pad), f32).at[:, :H2].set(params["be2"].astype(f32))
    w3 = jnp.zeros((1, H2_pad), f32).at[:, :H2].set(params["w3"].astype(f32).T)
    b3 = params["b3"].astype(f32).reshape(1, 1)

    weights = (w1, b1, g1, be1, w2, b2, g2, be2, w3, b3)

    vmem_cap, budget = _vmem_budget()

    # Batch-tile cap: big tiles at small C (amortize per-grid-step overhead), small
    # tiles at large C so the pipelined x/out buffers leave room for resident weights
    # (the 128-row cap is the v7x / 64 MiB regime).
    if C_pad <= 1024:
        tb_cap = 512
    elif C_pad < 4096 or budget >= (96 << 20):
        tb_cap = 256
    else:
        tb_cap = 128

    wi = mm.itemsize
    resident_small = sum(int(a.size) * a.dtype.itemsize for a in weights[1:])

    def fits(tk_cand, nk):
        w1_bufs = 1 if nk == 1 else 2                 # resident (Buffered(1)) vs pipelined
        acc = 0 if nk == 1 else tb_cap * H1_pad * 4   # h1 accumulator scratch
        xk = 0 if nk == 1 else 2 * tb_cap * tk_cand * 4
        tiles = 2 * 2 * tb_cap * C_pad * 4            # x + out, double-buffered
        return (resident_small + w1_bufs * tk_cand * H1_pad * wi
                + acc + xk + tiles) <= budget

    if k_tiles is not None:                           # explicit override (tests / tuning)
        assert (C_pad // 128) % k_tiles == 0, "k_tiles must divide C_pad // 128"
        tk = C_pad // k_tiles
    else:
        tk = 128
        for nk in range(1, C_pad // 128 + 1):         # smallest nk (largest tk) that fits
            if (C_pad // 128) % nk:
                continue
            if fits(C_pad // nk, nk):
                tk = C_pad // nk
                break
    num_k = C_pad // tk

    return dict(C=C, H1=H1, H2=H2, C_pad=C_pad, H1_pad=H1_pad, H2_pad=H2_pad,
                tk=tk, num_k=num_k, tb_cap=tb_cap, budget=budget, vmem_cap=vmem_cap,
                mm_dtype=mm, weights=weights)


def gaussian_blur_conv(x, prepared):
    """Forward pass. `prepared` comes from prepare_params (weights padded/cast once)."""
    B, C = x.shape
    p = prepared
    assert C == p["C"], "in_channels mismatch with prepared params"
    C_pad, H1_pad, H2_pad = p["C_pad"], p["H1_pad"], p["H2_pad"]
    tk, num_k = p["tk"], p["num_k"]
    weights = p["weights"]
    w1 = weights[0]
    f32 = jnp.float32

    # Batch tile: sublane multiple; >= 2 tiles whenever B > 8 so the "parallel" batch
    # axis can shard across v7x's two TensorCores (on v5e/v6e it is just more pipeline
    # steps, which is free).
    if B <= 8:
        TB = _round_up(B, 8)
    else:
        TB = min(_round_up(_cdiv(B, 2), 8), p["tb_cap"])

    def vmem_need(tb):
        resident = sum(int(a.size) * a.dtype.itemsize for a in weights[1:])
        w1b = (1 if num_k == 1 else 2) * tk * H1_pad * w1.dtype.itemsize
        acc = 0 if num_k == 1 else tb * H1_pad * 4
        xk = 0 if num_k == 1 else 2 * tb * tk * 4
        return resident + w1b + acc + xk + 2 * 2 * tb * C_pad * 4

    while vmem_need(TB) > p["budget"] and TB > 8:     # shrink the tile, not the limit
        TB = max(8, TB // 2)

    B_pad = _round_up(B, TB)
    xp = jnp.zeros((B_pad, C_pad), f32).at[:B, :C].set(x.astype(f32))

    grid = (B_pad // TB, num_k)
    tile_map = lambda i, k: (i, 0)
    const_map = lambda i, k: (0, 0)

    def resident_spec(shape):
        # Never-refetched weights: single-buffer them (halves their VMEM footprint;
        # matters most on v7x's 64 MiB VMEM).
        try:
            return pl.BlockSpec(shape, const_map, pipeline_mode=pl.Buffered(1))
        except TypeError:                              # older jax without pipeline_mode
            return pl.BlockSpec(shape, const_map)

    x_spec = pl.BlockSpec((TB, C_pad), tile_map)
    out_spec = pl.BlockSpec((TB, C_pad), tile_map)
    rest_specs = [resident_spec(w.shape) for w in weights[1:]]

    common = dict(h1_dim=p["H1"], h1_pad=H1_pad, h2_dim=p["H2"], h2_pad=H2_pad,
                  mm_dtype=p["mm_dtype"])

    if num_k == 1:
        kernel = functools.partial(_fused_kernel, **common)
        in_specs = [x_spec, resident_spec(w1.shape)] + rest_specs
        inputs = (xp,) + weights
        scratch = []
    else:
        kernel = functools.partial(_ktiled_kernel, num_k=num_k, **common)
        in_specs = [x_spec,
                    pl.BlockSpec((TB, tk), lambda i, k: (i, k)),       # x K-slice (matmul)
                    pl.BlockSpec((tk, H1_pad), lambda i, k: (k, 0))    # w1 K-tile
                    ] + rest_specs
        inputs = (xp, xp) + weights
        scratch = [pltpu.VMEM((TB, H1_pad), jnp.float32)]              # h1 accumulator

    vmem_limit = int(min(p["vmem_cap"], max(vmem_need(TB) + (8 << 20), 32 << 20)))

    out = pl.pallas_call(
        kernel,
        out_shape=jax.ShapeDtypeStruct((B_pad, C_pad), f32),
        grid=grid,
        in_specs=in_specs,
        out_specs=out_spec,
        scratch_shapes=scratch,
        compiler_params=pltpu.CompilerParams(
            dimension_semantics=("parallel", "arbitrary"),
            vmem_limit_bytes=vmem_limit),
    )(*inputs)

    return out[:B, :C].astype(x.dtype)


# --------------------------------------------------------------------------------------
# Reference + demo
# --------------------------------------------------------------------------------------

def init_params(key, in_channels):
    h1 = in_channels // 2
    ks = jax.random.split(key, 6)
    s = 0.1
    return {
        "w1": jax.random.normal(ks[0], (in_channels, h1), jnp.float32) * s,
        "b1": jax.random.normal(ks[1], (1, h1), jnp.float32) * s,
        "g1": jnp.ones((1, h1), jnp.float32),
        "be1": jnp.zeros((1, h1), jnp.float32),
        "w2": jax.random.normal(ks[2], (h1, 64), jnp.float32) * s,
        "b2": jax.random.normal(ks[3], (1, 64), jnp.float32) * s,
        "g2": jnp.ones((1, 64), jnp.float32),
        "be2": jnp.zeros((1, 64), jnp.float32),
        "w3": jax.random.normal(ks[4], (64, 1), jnp.float32) * s,
        "b3": jax.random.normal(ks[5], (1, 1), jnp.float32) * s,
    }


def reference(x, p):
    """Pure-JAX reference matching the PyTorch forward exactly (true-f32 matmuls)."""
    hi = lax.Precision.HIGHEST

    def ln(h, g, b):
        mu = jnp.mean(h, axis=-1, keepdims=True)
        var = jnp.mean((h - mu) ** 2, axis=-1, keepdims=True)
        return (h - mu) / jnp.sqrt(var + LN_EPS) * g + b

    h1 = ln(jnp.maximum(jnp.dot(x, p["w1"], precision=hi) + p["b1"], 0.0),
            p["g1"], p["be1"])
    h2 = ln(jnp.maximum(jnp.dot(h1, p["w2"], precision=hi) + p["b2"], 0.0),
            p["g2"], p["be2"])
    sigma = jax.nn.sigmoid(jnp.dot(h2, p["w3"], precision=hi) + p["b3"]) + 1e-10  # (B,1)
    taps = jnp.arange(-PAD, PAD + 1, dtype=jnp.float32)                           # [-2..2]
    k = jnp.exp(-0.5 * (taps[None, :] / sigma) ** 2)
    k = k / jnp.sum(k, axis=-1, keepdims=True)
    B, C = x.shape
    xp = jnp.pad(x, ((0, 0), (PAD, PAD)))
    out = jnp.zeros((B, C), jnp.float32)
    for t in range(KSIZE):
        out = out + k[:, t:t + 1] * xp[:, t:t + C]
    return out


if __name__ == "__main__":
    key = jax.random.PRNGKey(0)
    kx1, kp1, kx2, kp2 = jax.random.split(key, 4)

    # --- 1) small shape implied by the module: batch=4, in_channels = seq_len = 32 ---
    B, C = 4, 32
    x = jax.random.normal(kx1, (B, C), jnp.float32)
    params = init_params(kp1, C)
    ref = reference(x, params)

    prepared = prepare_params(params)                                  # bf16 MXU path
    out = jax.block_until_ready(gaussian_blur_conv(x, prepared))
    assert out.shape == (B, C)
    # bf16 matmuls only perturb sigma slightly (the blur is smooth in sigma).
    assert jnp.allclose(out, ref, atol=3e-2, rtol=3e-2), "bf16 path mismatch"

    prepared_f32 = prepare_params(params, matmul_dtype=jnp.float32)    # exact f32 path
    out_f32 = jax.block_until_ready(gaussian_blur_conv(x, prepared_f32))
    assert jnp.allclose(out_f32, ref, atol=1e-4, rtol=1e-4), "f32 path mismatch"

    # --- 2) exercise the w1 K-tiling path (large-in_channels / v7x-VMEM regime) at a
    #        small forced size: C=300 -> C_pad=384, 3 K-tiles of 128, 2 batch tiles ---
    B2, C2 = 16, 300
    x2 = jax.random.normal(kx2, (B2, C2), jnp.float32)
    params2 = init_params(kp2, C2)
    prepared2 = prepare_params(params2, k_tiles=3)
    out2 = jax.block_until_ready(gaussian_blur_conv(x2, prepared2))
    ref2 = reference(x2, params2)
    assert jnp.allclose(out2, ref2, atol=3e-2, rtol=3e-2), "k-tiled path mismatch"

    print("KERNEL_OK")
</pallas_src>

<mosaic_0001>
module attributes {stable_mosaic.version = 11 : i64} {
  func.func @_fused_kernel(%arg0: i32, %arg1: i32, %arg2: memref<8x128xf32, #tpu.memory_space<vmem>>, %arg3: memref<128x128xbf16, #tpu.memory_space<vmem>>, %arg4: memref<1x128xf32, #tpu.memory_space<vmem>>, %arg5: memref<1x128xf32, #tpu.memory_space<vmem>>, %arg6: memref<1x128xf32, #tpu.memory_space<vmem>>, %arg7: memref<128x128xbf16, #tpu.memory_space<vmem>>, %arg8: memref<1x128xf32, #tpu.memory_space<vmem>>, %arg9: memref<1x128xf32, #tpu.memory_space<vmem>>, %arg10: memref<1x128xf32, #tpu.memory_space<vmem>>, %arg11: memref<1x128xf32, #tpu.memory_space<vmem>>, %arg12: memref<1x1xf32, #tpu.memory_space<vmem>>, %arg13: memref<8x128xf32, #tpu.memory_space<vmem>>) attributes {dimension_semantics = [#tpu.dimension_semantics<parallel>, #tpu.dimension_semantics<arbitrary>], iteration_bounds = array<i64: 1, 1>, scalar_prefetch = 0 : i64, scratch_operands = 0 : i64, tpu.core_type = #tpu.core_type<tc>, window_params = [{transform_indices = @transform_0, window_bounds = array<i64: 8, 128>}, {pipeline_mode = #tpu.pipeline_mode<synchronous>, transform_indices = @transform_1, window_bounds = array<i64: 128, 128>}, {pipeline_mode = #tpu.pipeline_mode<synchronous>, transform_indices = @transform_2, window_bounds = array<i64: 1, 128>}, {pipeline_mode = #tpu.pipeline_mode<synchronous>, transform_indices = @transform_3, window_bounds = array<i64: 1, 128>}, {pipeline_mode = #tpu.pipeline_mode<synchronous>, transform_indices = @transform_4, window_bounds = array<i64: 1, 128>}, {pipeline_mode = #tpu.pipeline_mode<synchronous>, transform_indices = @transform_5, window_bounds = array<i64: 128, 128>}, {pipeline_mode = #tpu.pipeline_mode<synchronous>, transform_indices = @transform_6, window_bounds = array<i64: 1, 128>}, {pipeline_mode = #tpu.pipeline_mode<synchronous>, transform_indices = @transform_7, window_bounds = array<i64: 1, 128>}, {pipeline_mode = #tpu.pipeline_mode<synchronous>, transform_indices = @transform_8, window_bounds = array<i64: 1, 128>}, {pipeline_mode = #tpu.pipeline_mode<synchronous>, transform_indices = @transform_9, window_bounds = array<i64: 1, 128>}, {pipeline_mode = #tpu.pipeline_mode<synchronous>, transform_indices = @transform_10, window_bounds = array<i64: 1, 1>}, {transform_indices = @transform_11, window_bounds = array<i64: 8, 128>}]} {
    %c0 = arith.constant 0 : index
    %c0_0 = arith.constant 0 : index
    %0 = vector.load %arg2[%c0, %c0_0] : memref<8x128xf32, #tpu.memory_space<vmem>>, vector<8x128xf32>
    %1 = arith.truncf %0 : vector<8x128xf32> to vector<8x128xbf16>
    %c0_1 = arith.constant 0 : index
    %c0_2 = arith.constant 0 : index
    %2 = vector.load %arg3[%c0_1, %c0_2] : memref<128x128xbf16, #tpu.memory_space<vmem>>, vector<128x128xbf16>
    %cst = arith.constant dense<0.000000e+00> : vector<8x128xf32>
    %3 = tpu.matmul %1, %2, %cst {dimension_numbers = #tpu.dot_dimension_numbers<[1], [0], [0], [1], [0, 0, 1, 1], [], []>} : vector<8x128xbf16>, vector<128x128xbf16>, vector<8x128xf32> -> vector<8x128xf32>
    %c0_3 = arith.constant 0 : index
    %c0_4 = arith.constant 0 : index
    %4 = vector.load %arg4[%c0_3, %c0_4] : memref<1x128xf32, #tpu.memory_space<vmem>>, vector<1x128xf32>
    %5 = vector.broadcast %4 : vector<1x128xf32> to vector<8x128xf32>
    %6 = arith.addf %3, %5 : vector<8x128xf32>
    %cst_5 = arith.constant 0.000000e+00 : f32
    %7 = vector.broadcast %cst_5 : f32 to vector<8x128xf32>
    %8 = arith.maximumf %6, %7 : vector<8x128xf32>
    %c0_6 = arith.constant 0 : index
    %c0_7 = arith.constant 0 : index
    %9 = vector.load %arg5[%c0_6, %c0_7] : memref<1x128xf32, #tpu.memory_space<vmem>>, vector<1x128xf32>
    %c0_8 = arith.constant 0 : index
    %c0_9 = arith.constant 0 : index
    %10 = vector.load %arg6[%c0_8, %c0_9] : memref<1x128xf32, #tpu.memory_space<vmem>>, vector<1x128xf32>
    %cst_10 = arith.constant dense<0.000000e+00> : vector<8xf32>
    %11 = vector.multi_reduction <add>, %8, %cst_10 [1] : vector<8x128xf32> to vector<8xf32>
    %12 = vector.shape_cast %11 : vector<8xf32> to vector<8x1xf32>
    %cst_11 = arith.constant 6.250000e-02 : f32
    %13 = vector.broadcast %cst_11 : f32 to vector<8x1xf32>
    %14 = arith.mulf %12, %13 : vector<8x1xf32>
    %15 = vector.broadcast %14 : vector<8x1xf32> to vector<8x128xf32>
    %16 = arith.subf %8, %15 : vector<8x128xf32>
    %17 = arith.mulf %16, %16 : vector<8x128xf32>
    %cst_12 = arith.constant dense<0.000000e+00> : vector<8xf32>
    %18 = vector.multi_reduction <add>, %17, %cst_12 [1] : vector<8x128xf32> to vector<8xf32>
    %19 = vector.shape_cast %18 : vector<8xf32> to vector<8x1xf32>
    %20 = arith.mulf %14, %14 : vector<8x1xf32>
    %cst_13 = arith.constant 1.120000e+02 : f32
    %21 = vector.broadcast %cst_13 : f32 to vector<8x1xf32>
    %22 = arith.mulf %21, %20 : vector<8x1xf32>
    %23 = arith.subf %19, %22 : vector<8x1xf32>
    %cst_14 = arith.constant 6.250000e-02 : f32
    %24 = vector.broadcast %cst_14 : f32 to vector<8x1xf32>
    %25 = arith.mulf %23, %24 : vector<8x1xf32>
    %cst_15 = arith.constant 0.000000e+00 : f32
    %26 = vector.broadcast %cst_15 : f32 to vector<8x1xf32>
    %27 = arith.maximumf %25, %26 : vector<8x1xf32>
    %cst_16 = arith.constant 9.99999974E-6 : f32
    %28 = vector.broadcast %cst_16 : f32 to vector<8x1xf32>
    %29 = arith.addf %27, %28 : vector<8x1xf32>
    %30 = math.rsqrt %29 : vector<8x1xf32>
    %31 = vector.broadcast %30 : vector<8x1xf32> to vector<8x128xf32>
    %32 = arith.mulf %16, %31 : vector<8x128xf32>
    %33 = vector.broadcast %9 : vector<1x128xf32> to vector<8x128xf32>
    %34 = arith.mulf %32, %33 : vector<8x128xf32>
    %35 = vector.broadcast %10 : vector<1x128xf32> to vector<8x128xf32>
    %36 = arith.addf %34, %35 : vector<8x128xf32>
    %37 = arith.truncf %36 : vector<8x128xf32> to vector<8x128xbf16>
    %c0_17 = arith.constant 0 : index
    %c0_18 = arith.constant 0 : index
    %38 = vector.load %arg7[%c0_17, %c0_18] : memref<128x128xbf16, #tpu.memory_space<vmem>>, vector<128x128xbf16>
    %cst_19 = arith.constant dense<0.000000e+00> : vector<8x128xf32>
    %39 = tpu.matmul %37, %38, %cst_19 {dimension_numbers = #tpu.dot_dimension_numbers<[1], [0], [0], [1], [0, 0, 1, 1], [], []>} : vector<8x128xbf16>, vector<128x128xbf16>, vector<8x128xf32> -> vector<8x128xf32>
    %c0_20 = arith.constant 0 : index
    %c0_21 = arith.constant 0 : index
    %40 = vector.load %arg8[%c0_20, %c0_21] : memref<1x128xf32, #tpu.memory_space<vmem>>, vector<1x128xf32>
    %41 = vector.broadcast %40 : vector<1x128xf32> to vector<8x128xf32>
    %42 = arith.addf %39, %41 : vector<8x128xf32>
    %cst_22 = arith.constant 0.000000e+00 : f32
    %43 = vector.broadcast %cst_22 : f32 to vector<8x128xf32>
    %44 = arith.maximumf %42, %43 : vector<8x128xf32>
    %c0_23 = arith.constant 0 : index
    %c0_24 = arith.constant 0 : index
    %45 = vector.load %arg9[%c0_23, %c0_24] : memref<1x128xf32, #tpu.memory_space<vmem>>, vector<1x128xf32>
    %c0_25 = arith.constant 0 : index
    %c0_26 = arith.constant 0 : index
    %46 = vector.load %arg10[%c0_25, %c0_26] : memref<1x128xf32, #tpu.memory_space<vmem>>, vector<1x128xf32>
    %cst_27 = arith.constant dense<0.000000e+00> : vector<8xf32>
    %47 = vector.multi_reduction <add>, %44, %cst_27 [1] : vector<8x128xf32> to vector<8xf32>
    %48 = vector.shape_cast %47 : vector<8xf32> to vector<8x1xf32>
    %cst_28 = arith.constant 1.562500e-02 : f32
    %49 = vector.broadcast %cst_28 : f32 to vector<8x1xf32>
    %50 = arith.mulf %48, %49 : vector<8x1xf32>
    %51 = vector.broadcast %50 : vector<8x1xf32> to vector<8x128xf32>
    %52 = arith.subf %44, %51 : vector<8x128xf32>
    %53 = arith.mulf %52, %52 : vector<8x128xf32>
    %cst_29 = arith.constant dense<0.000000e+00> : vector<8xf32>
    %54 = vector.multi_reduction <add>, %53, %cst_29 [1] : vector<8x128xf32> to vector<8xf32>
    %55 = vector.shape_cast %54 : vector<8xf32> to vector<8x1xf32>
    %56 = arith.mulf %50, %50 : vector<8x1xf32>
    %cst_30 = arith.constant 6.400000e+01 : f32
    %57 = vector.broadcast %cst_30 : f32 to vector<8x1xf32>
    %58 = arith.mulf %57, %56 : vector<8x1xf32>
    %59 = arith.subf %55, %58 : vector<8x1xf32>
    %cst_31 = arith.constant 1.562500e-02 : f32
    %60 = vector.broadcast %cst_31 : f32 to vector<8x1xf32>
    %61 = arith.mulf %59, %60 : vector<8x1xf32>
    %cst_32 = arith.constant 0.000000e+00 : f32
    %62 = vector.broadcast %cst_32 : f32 to vector<8x1xf32>
    %63 = arith.maximumf %61, %62 : vector<8x1xf32>
    %cst_33 = arith.constant 9.99999974E-6 : f32
    %64 = vector.broadcast %cst_33 : f32 to vector<8x1xf32>
    %65 = arith.addf %63, %64 : vector<8x1xf32>
    %66 = math.rsqrt %65 : vector<8x1xf32>
    %67 = vector.broadcast %66 : vector<8x1xf32> to vector<8x128xf32>
    %68 = arith.mulf %52, %67 : vector<8x128xf32>
    %69 = vector.broadcast %45 : vector<1x128xf32> to vector<8x128xf32>
    %70 = arith.mulf %68, %69 : vector<8x128xf32>
    %71 = vector.broadcast %46 : vector<1x128xf32> to vector<8x128xf32>
    %72 = arith.addf %70, %71 : vector<8x128xf32>
    %c0_34 = arith.constant 0 : index
    %c0_35 = arith.constant 0 : index
    %73 = vector.load %arg11[%c0_34, %c0_35] : memref<1x128xf32, #tpu.memory_space<vmem>>, vector<1x128xf32>
    %74 = vector.broadcast %73 : vector<1x128xf32> to vector<8x128xf32>
    %75 = arith.mulf %72, %74 : vector<8x128xf32>
    %cst_36 = arith.constant dense<0.000000e+00> : vector<8xf32>
    %76 = vector.multi_reduction <add>, %75, %cst_36 [1] : vector<8x128xf32> to vector<8xf32>
    %77 = vector.shape_cast %76 : vector<8xf32> to vector<8x1xf32>
    %c0_37 = arith.constant 0 : index
    %c0_38 = arith.constant 0 : index
    %78 = vector.load %arg12[%c0_37, %c0_38] : memref<1x1xf32, #tpu.memory_space<vmem>>, vector<1x1xf32>
    %79 = vector.broadcast %78 : vector<1x1xf32> to vector<8x1xf32>
    %80 = arith.addf %77, %79 : vector<8x1xf32>
    %cst_39 = arith.constant 5.000000e-01 : f32
    %81 = vector.broadcast %cst_39 : f32 to vector<8x1xf32>
    %82 = arith.mulf %81, %80 : vector<8x1xf32>
    %83 = math.tanh %82 : vector<8x1xf32>
    %cst_40 = arith.constant 1.000000e+00 : f32
    %84 = vector.broadcast %cst_40 : f32 to vector<8x1xf32>
    %85 = arith.addf %83, %84 : vector<8x1xf32>
    %cst_41 = arith.constant 5.000000e-01 : f32
    %86 = vector.broadcast %cst_41 : f32 to vector<8x1xf32>
    %87 = arith.mulf %86, %85 : vector<8x1xf32>
    %cst_42 = arith.constant 1.000000e-10 : f32
    %88 = vector.broadcast %cst_42 : f32 to vector<8x1xf32>
    %89 = arith.addf %87, %88 : vector<8x1xf32>
    %90 = arith.mulf %89, %89 : vector<8x1xf32>
    %cst_43 = arith.constant -5.000000e-01 : f32
    %91 = vector.broadcast %cst_43 : f32 to vector<8x1xf32>
    %92 = arith.divf %91, %90 : vector<8x1xf32>
    %93 = math.exp %92 : vector<8x1xf32>
    %cst_44 = arith.constant 4.000000e+00 : f32
    %94 = vector.broadcast %cst_44 : f32 to vector<8x1xf32>
    %95 = arith.mulf %94, %92 : vector<8x1xf32>
    %96 = math.exp %95 : vector<8x1xf32>
    %97 = arith.addf %93, %96 : vector<8x1xf32>
    %cst_45 = arith.constant 2.000000e+00 : f32
    %98 = vector.broadcast %cst_45 : f32 to vector<8x1xf32>
    %99 = arith.mulf %98, %97 : vector<8x1xf32>
    %cst_46 = arith.constant 1.000000e+00 : f32
    %100 = vector.broadcast %cst_46 : f32 to vector<8x1xf32>
    %101 = arith.addf %100, %99 : vector<8x1xf32>
    %cst_47 = arith.constant 1.000000e+00 : f32
    %102 = vector.broadcast %cst_47 : f32 to vector<8x1xf32>
    %103 = arith.divf %102, %101 : vector<8x1xf32>
    %c1_i32 = arith.constant 1 : i32
    %104 = tpu.dynamic_rotate %0 by %c1_i32 dim 1 : vector<8x128xf32>, i32 -> vector<8x128xf32>
    %c127_i32 = arith.constant 127 : i32
    %105 = tpu.dynamic_rotate %0 by %c127_i32 dim 1 : vector<8x128xf32>, i32 -> vector<8x128xf32>
    %106 = arith.addf %104, %105 : vector<8x128xf32>
    %107 = vector.broadcast %93 : vector<8x1xf32> to vector<8x128xf32>
    %108 = arith.mulf %107, %106 : vector<8x128xf32>
    %109 = arith.addf %0, %108 : vector<8x128xf32>
    %c2_i32 = arith.constant 2 : i32
    %110 = tpu.dynamic_rotate %0 by %c2_i32 dim 1 : vector<8x128xf32>, i32 -> vector<8x128xf32>
    %c126_i32 = arith.constant 126 : i32
    %111 = tpu.dynamic_rotate %0 by %c126_i32 dim 1 : vector<8x128xf32>, i32 -> vector<8x128xf32>
    %112 = arith.addf %110, %111 : vector<8x128xf32>
    %113 = vector.broadcast %96 : vector<8x1xf32> to vector<8x128xf32>
    %114 = arith.mulf %113, %112 : vector<8x128xf32>
    %115 = arith.addf %109, %114 : vector<8x128xf32>
    %116 = vector.broadcast %103 : vector<8x1xf32> to vector<8x128xf32>
    %117 = arith.mulf %115, %116 : vector<8x128xf32>
    %c0_48 = arith.constant 0 : index
    %c0_49 = arith.constant 0 : index
    %118 = vector.load %arg13[%c0_48, %c0_49] : memref<8x128xf32, #tpu.memory_space<vmem>>, vector<8x128xf32>
    tpu.vector_store %arg13[%c0_48, %c0_49], %117 {strides = array<i32>} : memref<8x128xf32, #tpu.memory_space<vmem>>, vector<8x128xf32>,
    return
  }
  func.func @transform_0(%arg0: i32, %arg1: i32) -> (i32, i32) {
    %c0_i32 = arith.constant 0 : i32
    %c0_i32_0 = arith.constant 0 : i32
    return %arg0, %c0_i32 : i32, i32
  }
  func.func @transform_1(%arg0: i32, %arg1: i32) -> (i32, i32) {
    %c0_i32 = arith.constant 0 : i32
    %c0_i32_0 = arith.constant 0 : i32
    %c0_i32_1 = arith.constant 0 : i32
    return %c0_i32, %c0_i32_0 : i32, i32
  }
  func.func @transform_2(%arg0: i32, %arg1: i32) -> (i32, i32) {
    %c0_i32 = arith.constant 0 : i32
    %c0_i32_0 = arith.constant 0 : i32
    %c0_i32_1 = arith.constant 0 : i32
    return %c0_i32, %c0_i32_0 : i32, i32
  }
  func.func @transform_3(%arg0: i32, %arg1: i32) -> (i32, i32) {
    %c0_i32 = arith.constant 0 : i32
    %c0_i32_0 = arith.constant 0 : i32
    %c0_i32_1 = arith.constant 0 : i32
    return %c0_i32, %c0_i32_0 : i32, i32
  }
  func.func @transform_4(%arg0: i32, %arg1: i32) -> (i32, i32) {
    %c0_i32 = arith.constant 0 : i32
    %c0_i32_0 = arith.constant 0 : i32
    %c0_i32_1 = arith.constant 0 : i32
    return %c0_i32, %c0_i32_0 : i32, i32
  }
  func.func @transform_5(%arg0: i32, %arg1: i32) -> (i32, i32) {
    %c0_i32 = arith.constant 0 : i32
    %c0_i32_0 = arith.constant 0 : i32
    %c0_i32_1 = arith.constant 0 : i32
    return %c0_i32, %c0_i32_0 : i32, i32
  }
  func.func @transform_6(%arg0: i32, %arg1: i32) -> (i32, i32) {
    %c0_i32 = arith.constant 0 : i32
    %c0_i32_0 = arith.constant 0 : i32
    %c0_i32_1 = arith.constant 0 : i32
    return %c0_i32, %c0_i32_0 : i32, i32
  }
  func.func @transform_7(%arg0: i32, %arg1: i32) -> (i32, i32) {
    %c0_i32 = arith.constant 0 : i32
    %c0_i32_0 = arith.constant 0 : i32
    %c0_i32_1 = arith.constant 0 : i32
    return %c0_i32, %c0_i32_0 : i32, i32
  }
  func.func @transform_8(%arg0: i32, %arg1: i32) -> (i32, i32) {
    %c0_i32 = arith.constant 0 : i32
    %c0_i32_0 = arith.constant 0 : i32
    %c0_i32_1 = arith.constant 0 : i32
    return %c0_i32, %c0_i32_0 : i32, i32
  }
  func.func @transform_9(%arg0: i32, %arg1: i32) -> (i32, i32) {
    %c0_i32 = arith.constant 0 : i32
    %c0_i32_0 = arith.constant 0 : i32
    %c0_i32_1 = arith.constant 0 : i32
    return %c0_i32, %c0_i32_0 : i32, i32
  }
  func.func @transform_10(%arg0: i32, %arg1: i32) -> (i32, i32) {
    %c0_i32 = arith.constant 0 : i32
    %c0_i32_0 = arith.constant 0 : i32
    %c0_i32_1 = arith.constant 0 : i32
    return %c0_i32, %c0_i32_0 : i32, i32
  }
  func.func @transform_11(%arg0: i32, %arg1: i32) -> (i32, i32) {
    %c0_i32 = arith.constant 0 : i32
    %c0_i32_0 = arith.constant 0 : i32
    return %arg0, %c0_i32 : i32, i32
  }
}

</mosaic_0001>

<bundles_post_ra>
// kernel: tpu_custom_call.1
= control target key start
LH: loop header
LB: loop body
LE: loop exit
PB: predicated region body
PF: predicated region fallthrough
CT: control target
= control target key end

     0   :  { %s760_s0 = inlined_call_operand.hbm [shape: f32[8,128], index: 0, kind: input, shape index: {}]   ;;  %s761_s1 = inlined_call_operand.hbm [shape: bf16[128,128], index: 1, kind: input, shape index: {}]   ;;  %s762_s2 = inlined_call_operand.vmem [shape: f32[1,128], index: 2, kind: input, shape index: {}]   ;;  %s763_s3 = inlined_call_operand.vmem [shape: f32[1,128], index: 3, kind: input, shape index: {}]   ;;  %s764_s4 = inlined_call_operand.vmem [shape: f32[1,128], index: 4, kind: input, shape index: {}]   ;;  %s765_s5 = inlined_call_operand.hbm [shape: bf16[128,128], index: 5, kind: input, shape index: {}]   ;;  %s766_s6 = inlined_call_operand.vmem [shape: f32[1,128], index: 6, kind: input, shape index: {}]   ;;  %s767_s7 = inlined_call_operand.vmem [shape: f32[1,128], index: 7, kind: input, shape index: {}]   ;;  %s768_s8 = inlined_call_operand.vmem [shape: f32[1,128], index: 8, kind: input, shape index: {}]   ;;  %s769_s9 = inlined_call_operand.vmem [shape: f32[1,128], index: 9, kind: input, shape index: {}]   ;;  %s770_s10 = inlined_call_operand.<no memory space> [shape: f32[1,1], index: 10, kind: input, shape index: {}]   ;;  %s771_s11 = inlined_call_operand.hbm [shape: f32[8,128], index: 11, kind: output, shape index: {}]  }
   0x1   :  { %v16_v0 = vstv %s770_s10 }
   0x2   :  { %17 = vst [vmem:[#allocation2] sm:$0x1] %v16_v0 }
   0x3   :  { %18 = vsyncpa [#allocation4], 0 }
   0x4   :  { %19 = vsyncpa [#allocation7], 0  ;;  %s36_s21 = sshll.u32 %s761_s1, 4  ;;  %s37_s21 = int_to_ptr.hbm [resolvable:$true] %s36_s21 }
   0x5   :  { %20 = vsyncpa [#allocation5], 0  ;;  %s644_s22 = smov [#allocation6]   ;;  %s26_s26 = sshll.u32 %s760_s0, 4  ;;  %s27_s26 = int_to_ptr.hbm [resolvable:$true] %s26_s26 }
   0x6   :  { %s38_s23 = sshll.u32 %s644_s22, 4  ;;  %s645_s27 = smov 64   ;;  %s39_s23 = int_to_ptr.vmem [resolvable:$true] %s38_s23 }
   0x7   :  { %s646_s28 = smov 4   ;;  %s647_s10 = smov [#allocation3]  }
   0x8   :  { %44 = dma.hbm_to_vmem [thread:$0]  %s37_s21, 1024, %s39_s23, [#allocation7], %s645_s27, %s645_s27, %s646_s28  }
   0x9   :  { %s28_s29 = sshll.u32 %s647_s10, 4  ;;  %s55_s13 = sshll.u32 %s765_s5, 4  ;;  %s29_s29 = int_to_ptr.vmem [resolvable:$true] %s28_s29  ;;  %s56_s13 = int_to_ptr.hbm [resolvable:$true] %s55_s13 }
   0xa   :  { %31 = dma.hbm_to_vmem [thread:$0]  %s27_s26, 128, %s29_s29, [#allocation4]  }
   0xb   :  { %s648_s1 = smov [#allocation8]  }
   0xc   :  { %s57_s14 = sshll.u32 %s648_s1, 4  ;;  %s58_s14 = int_to_ptr.vmem [resolvable:$true] %s57_s14 }
   0xd   :  { %63 = dma.hbm_to_vmem [thread:$0]  %s56_s13, 1024, %s58_s14, [#allocation7], %s645_s27, %s645_s27, %s646_s28  }
   0xe   :  { %638 = dma.done.wait [#allocation4], 128  }
   0xf   :  { %639 = vsyncadd [#allocation4], 4294967168 }
  0x10   :  { %640 = dma.done.wait [#allocation7], 2048  }
  0x11   :  { %641 = vsyncadd [#allocation7], 4294965248  ;;  %v497_v1 = vld [vmem:[#allocation6 + $0x38] sm:$0xff]  ;;  %v496_v2 = vld [vmem:[#allocation6 + $0x30] sm:$0xff]  ;;  %s649_s23 = smov 127   ;;  %s650_s24 = smov 126  }
  0x12   :  { %156 = vmatpush.bf16.msra.mxu0 %v497_v1  ;;  %v495_v3 = vld [vmem:[#allocation6 + $0x28] sm:$0xff]  ;;  %v494_v4 = vld [vmem:[#allocation6 + $0x20] sm:$0xff]  ;;  %v493_v5 = vld [vmem:[#allocation6 + $0x18] sm:$0xff]  ;;  %s652_s25 = smov 2   ;;  %s415_s28 = sshll.u32 %s771_s11, 4  ;;  %s416_s28 = int_to_ptr.hbm [resolvable:$true] %s415_s28 }
  0x13   :  { %v492_v6 = vld [vmem:[#allocation6 + $0x10] sm:$0xff]  ;;  %v491_v7 = vld [vmem:[#allocation6 + $0x8] sm:$0xff]  ;;  %v490_v8 = vld [vmem:[#allocation6] sm:$0xff] }
  0x14   :  { %v727_v9 = vld [vmem:[#allocation3] sm:$0xff]  ;;  %v520_v11 = vld [vmem:[%s762_s2] ss:$0 sm:$0xff]  ;;  %v503_v22 = vld [vmem:[#allocation8 + $0x28] sm:$0xff] }
  0x15   :  { %v87_v10 = vpack.c.bf16 %v727_v9, %v727_v9  ;;  %v505_v20 = vld [vmem:[#allocation8 + $0x38] sm:$0xff]  ;;  %v504_v21 = vld [vmem:[#allocation8 + $0x30] sm:$0xff]  ;;  %v502_v23 = vld [vmem:[#allocation8 + $0x20] sm:$0xff] }
  0x16   :  { %157 = vmatpush.bf16.msra.mxu0 %v496_v2  ;;  %273 = vmatpush.bf16.msra.mxu1 %v505_v20  ;;  %v501_v24 = vld [vmem:[#allocation8 + $0x18] sm:$0xff]  ;;  %v500_v25 = vld [vmem:[#allocation8 + $0x10] sm:$0xff]  ;;  %v499_v26 = vld [vmem:[#allocation8 + $0x8] sm:$0xff] }
  0x17   :  { %v498_v28 = vld [vmem:[#allocation8] sm:$0xff]  ;;  %v521_v41 = vld [vmem:[%s763_s3] ss:$0 sm:$0xff] }
  0x18   :  { %v522_v44 = vld [vmem:[%s764_s4] ss:$0 sm:$0xff] }
  0x19   :  { %v523_v48 = vld [vmem:[%s766_s6] ss:$0 sm:$0xff] }
  0x1a   :  { %158 = vmatpush.bf16.msra.mxu0 %v495_v3  ;;  %274 = vmatpush.bf16.msra.mxu1 %v504_v21 }
  0x1e   :  { %159 = vmatpush.bf16.msra.mxu0 %v494_v4  ;;  %275 = vmatpush.bf16.msra.mxu1 %v503_v22 }
  0x22   :  { %160 = vmatpush.bf16.msra.mxu0 %v493_v5  ;;  %276 = vmatpush.bf16.msra.mxu1 %v502_v23 }
  0x26   :  { %161 = vmatpush.bf16.msra.mxu0 %v492_v6  ;;  %277 = vmatpush.bf16.msra.mxu1 %v501_v24  ;;  %v524_v6 = vld [vmem:[%s767_s7] ss:$0 sm:$0xff]  ;;  %s651_s7 = smov 1  }
  0x2a   :  { %162 = vmatpush.bf16.msra.mxu0 %v491_v7  ;;  %278 = vmatpush.bf16.msra.mxu1 %v500_v25 }
  0x2e   :  { %163 = vmatpush.bf16.msra.mxu0 %v490_v8  ;;  %279 = vmatpush.bf16.msra.mxu1 %v499_v26 }
  0x31   :  { %164 = vmatmul.bf16.vlgmr.msra.gmra.mxu0 %v87_v10  ;;  %v525_v10 = vld [vmem:[%s768_s8] ss:$0 sm:$0xff]  ;;  %s654_s8 = smov [#allocation9]  }
  0x32   :  { %280 = vmatpush.bf16.msra.mxu1 %v498_v28 }
  0xae   :  { %v165_v12 = vpop.f32.mrf.mxu0 }
  0xaf   :  { %v166_v13 = vadd.f32 %v520_v11, %v165_v12  ;;  %v526_v12 = vld [vmem:[%s769_s9] ss:$0 sm:$0xff]  ;;  %s413_s9 = sshll.u32 %s654_s8, 4  ;;  %s414_s9 = int_to_ptr.vmem [resolvable:$true] %s413_s9 }
  0xb1   :  { %v169_v14 = vmax.f32 %v166_v13, 0.0 }
  0xb3   :  { %172 = vadd.xlane.f32.xlu0 %v169_v14 }
  0xb6   :  { %v167_v15 = vpop.f32.mrf.mxu0 }
  0xb7   :  { %v527_v15 = vld [vmem:[#allocation2] ss:$0 sm:$0xff] }
 0x126   :  { %v173_v16 = vpop.xlane.xlu0 %172 }
 0x127   :  { %v174_v17 = vmul.f32 0.0625, %v173_v16 }
 0x129   :  { %v175_v18 = vsub.f32 %v169_v14, %v174_v17  ;;  %v179_v27 = vmul.f32 %v174_v17, %v174_v17 }
 0x12b   :  { %v176_v19 = vmul.f32 %v175_v18, %v175_v18  ;;  %v180_v29 = vmul.f32 112.0, %v179_v27 }
 0x12d   :  { %177 = vadd.xlane.f32.xlu0 %v176_v19 }
 0x141   :  { %379 = vrot.lane.b32.xlu0 %v727_v9, %s649_s23 }
 0x149   :  { %391 = vrot.lane.b32.xlu0 %v727_v9, %s650_s24 }
 0x1a0   :  { %v178_v30 = vpop.xlane.xlu0 %177 }
 0x1a1   :  { %v181_v31 = vsub.f32 %v178_v30, %v180_v29 }
 0x1a3   :  { %v182_v32 = vmul.f32 0.0625, %v181_v31 }
 0x1a5   :  { %v183_v33 = vmax.f32 %v182_v32, 0.0 }
 0x1a7   :  { %v184_v34 = vadd.f32 1e-05, %v183_v33 }
 0x1a9   :  { %528 = vrsqrt.f32 %v184_v34  ;;  %vm191_vm1 = vweird.f32 %v184_v34 }
 0x1af   :  { %v529_v35 = vpop.eup %528 }
 0x1b0   :  { %v186_v36 = vmul.f32 %v529_v35, %v184_v34  ;;  %vm192_vm0 = vweird.f32 %v529_v35 }
 0x1b1   :  { %vm193_vm2 = vmor %vm191_vm1, %vm192_vm0 }
 0x1b2   :  { %v187_v37 = vmul.f32 %v529_v35, %v186_v36 }
 0x1b4   :  { %v188_v38 = vmul.f32 0.5, %v187_v37 }
 0x1b6   :  { %v189_v39 = vsub.f32 1.5, %v188_v38 }
 0x1b8   :  { %v190_v40 = vmul.f32 %v529_v35, %v189_v39 }
 0x1ba   :  { %v194_v42 = vsel %vm193_vm2, %v529_v35, %v190_v40 }
 0x1bb   :  { %v195_v43 = vmul.f32 %v194_v42, %v175_v18  ;;  %v653_v18 = vmov 0  }
 0x1bc   :  { %517 = vset.pattern.permute.xlu1 %v653_v18  ;;  %518 = vset.pattern.permute.xlu2 %v653_v18 }
 0x1bd   :  { %v199_v45 = vmul.f32 %v521_v41, %v195_v43  ;;  %519 = vset.pattern.permute.xlu0 %v653_v18 }
 0x1bf   :  { %v203_v46 = vadd.f32 %v522_v44, %v199_v45 }
 0x1c1   :  { %v204_v47 = vpack.c.bf16 %v203_v46, %v203_v46 }
 0x1c3   :  { %281 = vmatmul.bf16.vlgmr.msra.gmra.mxu1 %v204_v47 }
 0x240   :  { %v282_v49 = vpop.f32.mrf.mxu1 }
 0x241   :  { %v283_v50 = vadd.f32 %v523_v48, %v282_v49 }
 0x243   :  { %v286_v51 = vmax.f32 %v283_v50, 0.0 }
 0x245   :  { %289 = vadd.xlane.f32.xlu1 %v286_v51 }
 0x248   :  { %v284_v52 = vpop.f32.mrf.mxu1 }
 0x2b8   :  { %v290_v53 = vpop.xlane.xlu1 %289 }
 0x2b9   :  { %v291_v54 = vmul.f32 0.015625, %v290_v53 }
 0x2bb   :  { %v292_v55 = vsub.f32 %v286_v51, %v291_v54  ;;  %v296_v57 = vmul.f32 %v291_v54, %v291_v54 }
 0x2bd   :  { %v293_v56 = vmul.f32 %v292_v55, %v292_v55  ;;  %v297_v58 = vmul.f32 64.0, %v296_v57 }
 0x2bf   :  { %294 = vadd.xlane.f32.xlu1 %v293_v56 }
 0x332   :  { %v295_v59 = vpop.xlane.xlu1 %294 }
 0x333   :  { %v298_v60 = vsub.f32 %v295_v59, %v297_v58 }
 0x335   :  { %v299_v61 = vmul.f32 0.015625, %v298_v60 }
 0x337   :  { %v300_v62 = vmax.f32 %v299_v61, 0.0 }
 0x339   :  { %v301_v63 = vadd.f32 1e-05, %v300_v62 }
 0x33b   :  { %530 = vrsqrt.f32 %v301_v63  ;;  %vm308_vm4 = vweird.f32 %v301_v63 }
 0x341   :  { %v531_v0 = vpop.eup %530 }
 0x342   :  { %v303_v1 = vmul.f32 %v531_v0, %v301_v63  ;;  %vm309_vm3 = vweird.f32 %v531_v0 }
 0x343   :  { %vm310_vm5 = vmor %vm308_vm4, %vm309_vm3 }
 0x344   :  { %v304_v2 = vmul.f32 %v531_v0, %v303_v1 }
 0x346   :  { %v305_v3 = vmul.f32 0.5, %v304_v2 }
 0x348   :  { %v306_v4 = vsub.f32 1.5, %v305_v3 }
 0x34a   :  { %v307_v5 = vmul.f32 %v531_v0, %v306_v4 }
 0x34c   :  { %v311_v7 = vsel %vm310_vm5, %v531_v0, %v307_v5 }
 0x34d   :  { %v312_v8 = vmul.f32 %v311_v7, %v292_v55  ;;  %v380_v55 = vpop.permute.xlu0 %379 }
 0x34f   :  { %v316_v11 = vmul.f32 %v524_v6, %v312_v8 }
 0x351   :  { %v320_v13 = vadd.f32 %v525_v10, %v316_v11 }
 0x353   :  { %v325_v14 = vmul.f32 %v526_v12, %v320_v13 }
 0x355   :  { %326 = vadd.xlane.f32.xlu2 %v325_v14  ;;  %v392_v59 = vpop.permute.xlu0 %391 }
 0x36d   :  { %377 = vrot.lane.b32.xlu2 %v727_v9, %s651_s7 }
 0x375   :  { %389 = vrot.lane.b32.xlu2 %v727_v9, %s652_s25 }
 0x3c8   :  { %v327_v16 = vpop.xlane.xlu2 %326 }
 0x3c9   :  { %v332_v17 = vadd.f32 %v527_v15, %v327_v16 }
 0x3cb   :  { %v333_v19 = vmul.f32 0.5, %v332_v17 }
 0x3cd   :  { %532 = vtanh.f32 %v333_v19 }
 0x3d0   :  { %v378_v54 = vpop.permute.xlu2 %377 }
 0x3d1   :  { %v381_v57 = vadd.f32 %v380_v55, %v378_v54 }
 0x3d3   :  { %v533_v20 = vpop.eup %532 }
 0x3d4   :  { %v335_v21 = vadd.f32 1.0, %v533_v20 }
 0x3d6   :  { %v336_v22 = vmul.f32 0.5, %v335_v21 }
 0x3d8   :  { %v337_v23 = vadd.f32 1e-10, %v336_v22  ;;  %v390_v56 = vpop.permute.xlu2 %389 }
 0x3d9   :  { %v393_v61 = vadd.f32 %v392_v59, %v390_v56 }
 0x3da   :  { %v338_v24 = vmul.f32 %v337_v23, %v337_v23 }
 0x3dc   :  { %534 = vrcp.f32 %v338_v24  ;;  %v350_v28 = vand.u32 2147483648, %v338_v24  ;;  %v348_v30 = vand.u32 2147483647, %v338_v24  ;;  %vm344_vm7 = vweird.f32 %v338_v24 }
 0x3de   :  { %v351_v32 = vor.u32 1.1754944e-38, %v350_v28  ;;  %vm349_vm9 = vcmp.eq.f32.partialorder %v348_v30, 8.507059e+37 }
 0x3e2   :  { %v535_v25 = vpop.eup %534 }
 0x3e3   :  { %v340_v26 = vmul.f32 %v535_v25, %v338_v24  ;;  %vm345_vm6 = vweird.f32 %v535_v25 }
 0x3e4   :  { %vm346_vm8 = vmor %vm344_vm7, %vm345_vm6 }
 0x3e5   :  { %v341_v27 = vsub.f32 1.0, %v340_v26 }
 0x3e7   :  { %v342_v29 = vmul.f32 %v535_v25, %v341_v27 }
 0x3e9   :  { %v343_v31 = vadd.f32 %v535_v25, %v342_v29 }
 0x3eb   :  { %v347_v33 = vsel %vm346_vm8, %v535_v25, %v343_v31 }
 0x3ec   :  { %v352_v34 = vsel %vm349_vm9, %v351_v32, %v347_v33 }
 0x3ed   :  { %v353_v35 = vmul.f32 -0.5, %v352_v34 }
 0x3ef   :  { %v354_v36 = vmul.f32 1.442695, %v353_v35  ;;  %v356_v37 = vmul.f32 4.0, %v353_v35 }
 0x3f1   :  { %536 = vpow2.f32 %v354_v36  ;;  %v357_v38 = vmul.f32 1.442695, %v356_v37 }
 0x3f3   :  { %538 = vpow2.f32 %v357_v38 }
 0x3f7   :  { %v537_v39 = vpop.eup %536 }
 0x3f8   :  { %384 = vperm.xlu1 %517, %v537_v39  }
 0x3f9   :  { %v539_v40 = vpop.eup %538 }
 0x3fa   :  { %396 = vperm.xlu2 %518, %v539_v40   ;;  %v359_v41 = vadd.f32 %v539_v40, %v537_v39 }
 0x3fc   :  { %v360_v42 = vmul.f32 2.0, %v359_v41 }
 0x3fe   :  { %v361_v43 = vadd.f32 1.0, %v360_v42 }
 0x400   :  { %540 = vrcp.f32 %v361_v43  ;;  %v373_v47 = vand.u32 2147483648, %v361_v43  ;;  %v371_v49 = vand.u32 2147483647, %v361_v43  ;;  %vm367_vm11 = vweird.f32 %v361_v43 }
 0x402   :  { %v374_v51 = vor.u32 1.1754944e-38, %v373_v47  ;;  %vm372_vm13 = vcmp.eq.f32.partialorder %v371_v49, 8.507059e+37 }
 0x406   :  { %v541_v44 = vpop.eup %540 }
 0x407   :  { %v363_v45 = vmul.f32 %v541_v44, %v361_v43  ;;  %vm368_vm10 = vweird.f32 %v541_v44 }
 0x408   :  { %vm369_vm12 = vmor %vm367_vm11, %vm368_vm10 }
 0x409   :  { %v364_v46 = vsub.f32 1.0, %v363_v45 }
 0x40b   :  { %v365_v48 = vmul.f32 %v541_v44, %v364_v46 }
 0x40d   :  { %v366_v50 = vadd.f32 %v541_v44, %v365_v48 }
 0x40f   :  { %v370_v52 = vsel %vm369_vm12, %v541_v44, %v366_v50 }
 0x410   :  { %v375_v53 = vsel %vm372_vm13, %v374_v51, %v370_v52 }
 0x411   :  { %403 = vperm.xlu1 %517, %v375_v53  }
 0x454   :  { %v397_v62 = vpop.permute.xlu2 %396 }
 0x455   :  { %v399_v0 = vmul.f32 %v397_v62, %v393_v61 }
 0x46a   :  { %v385_v58 = vpop.permute.xlu1 %384 }
 0x46b   :  { %v387_v60 = vmul.f32 %v385_v58, %v381_v57 }
 0x46d   :  { %v388_v63 = vadd.f32 %v387_v60, %v727_v9 }
 0x46f   :  { %v400_v1 = vadd.f32 %v399_v0, %v388_v63 }
 0x483   :  { %v404_v2 = vpop.permute.xlu1 %403 }
 0x484   :  { %v406_v3 = vmul.f32 %v404_v2, %v400_v1 }
 0x486   :  { %407 = vst [vmem:[#allocation9] sm:$0xff] %v406_v3 }
 0x487   :  { %418 = dma.vmem_to_hbm [thread:$0]  %s414_s9, 128, %s416_s28, [#allocation5]  }
 0x488   :  { %642 = dma.done.wait [#allocation5], 128  }
 0x489   :  { %643 = vsyncadd [#allocation5], 4294967168 }
 0x48a   :  { %423 = vsyncpa [#allocation4], 1 }
 0x48b   :  { %424 = vsyncpa [#allocation7], 1 }
 0x48c   :  { %425 = vsyncpa [#allocation5], 1 }

</bundles_post_ra>
